<compile_context>
chip_gen: v6e
topology: v6e:2x2x1
jax: 0.10.0
libtpu: 0.0.40
codegen_flags: <defaults>
</compile_context>

<pallas_src>
import functools

import jax
import jax.numpy as jnp
from jax.experimental import pallas as pl
from jax.experimental.pallas import tpu as pltpu

H1 = 64          # hidden sizes from the nn.Sequential
H2 = 32
PACK = 8         # batch rows packed per lane-dense "super-row"


def _mlp_kernel(x_ref, w1_ref, b1_ref, w2_ref, b2_ref, w3_ref, b3_ref, o_ref):
    # x_ref: (tn, PACK*D) packed rows; weights are block-diagonal (PACK copies),
    # so each matmul is the per-row Linear applied to 8 batch rows at once.
    h = jnp.dot(x_ref[...], w1_ref[...], preferred_element_type=jnp.float32)
    h = jnp.maximum(h + b1_ref[...], 0.0)
    h = jnp.dot(h, w2_ref[...], preferred_element_type=jnp.float32)
    h = jnp.maximum(h + b2_ref[...], 0.0)
    h = jnp.dot(h, w3_ref[...], preferred_element_type=jnp.float32)
    o_ref[...] = (h + b3_ref[...]).astype(o_ref.dtype)


def _round_up(n, m):
    return ((n + m - 1) // m) * m


def _lane(n):          # lane (last-dim) padding in VMEM
    return _round_up(n, 128)


def _sub(n):           # sublane padding in VMEM
    return _round_up(n, 8)


def _vmem_capacity_bytes():
    """Per-core VMEM capacity; conservative (v7x) fallback if query fails."""
    try:
        return int(pltpu.get_tpu_info().vmem_capacity_bytes)
    except Exception:
        return 64 * 1024 * 1024


def _vmem_bytes_estimate(tn, D, C):
    """Lane-padded f32 footprint for a packed tile of tn rows."""
    f32 = 4
    per_row = f32 * (2 * _lane(PACK * D)      # x tile, double-buffered
                     + 2 * _lane(PACK * C)    # out tile, double-buffered
                     + _lane(PACK * H1)       # h1 intermediate
                     + _lane(PACK * H2))      # h2 intermediate
    params = f32 * 2 * (                      # pessimistic: double-buffered
        _sub(PACK * D) * _lane(PACK * H1)
        + _sub(PACK * H1) * _lane(PACK * H2)
        + _sub(PACK * H2) * _lane(PACK * C)
        + 8 * (_lane(PACK * H1) + _lane(PACK * H2) + _lane(PACK * C)))
    return tn * per_row + params


@functools.partial(jax.jit, static_argnames=("tb",))
def agent_model_forward(x, w1, b1, w2, b2, w3, b3, *, tb=8192):
    """3-layer MLP forward.  `tb` = max batch rows per grid step."""
    B, D = x.shape
    C = w3.shape[1]

    # ---- pack PACK batch rows per super-row (row-major bitcast views) ------
    pad = (-B) % PACK
    if pad:
        # Only when B % 8 != 0 (pads <= 7 rows).  Multiple-of-8 batches never
        # copy x.  TODO(synk): handle the <=7 tail rows with a tiny pure-JAX
        # epilogue to avoid this copy entirely for ragged batch sizes.
        x = jnp.pad(x, ((0, pad), (0, 0)))
    Bp = B + pad
    n = Bp // PACK
    xp = x.reshape(n, PACK * D)               # free bitcast; 128 lanes for D=16

    # Block-diagonal weights / tiled biases (PACK copies each).
    eye = jnp.eye(PACK, dtype=x.dtype)
    w1p = jnp.kron(eye, w1)                   # (PACK*D,  PACK*H1)
    w2p = jnp.kron(eye, w2)                   # (PACK*H1, PACK*H2)
    w3p = jnp.kron(eye, w3)                   # (PACK*H2, PACK*C)
    b1p = jnp.tile(b1, (1, PACK))             # (1, PACK*H1)
    b2p = jnp.tile(b2, (1, PACK))             # (1, PACK*H2)
    b3p = jnp.tile(b3, (1, PACK))             # (1, PACK*C)

    # ---- tile selection against the *lane-padded* VMEM footprint -----------
    cap = _vmem_capacity_bytes()
    tn = max(1, tb // PACK)
    while tn > 8 and _vmem_bytes_estimate(tn, D, C) > cap // 2:
        tn //= 2
    if n <= tn:
        tn = n                                # single step: block == full array
    else:
        tn = max(8, (tn // 8) * 8)            # multi-step: sublane-aligned tile
    grid = (pl.cdiv(n, tn),)                  # ragged tail masked by Pallas

    est = _vmem_bytes_estimate(tn, D, C)
    cp_kwargs = {}
    if est > 12 * 1024 * 1024:                # above v5e's 16 MiB default limit
        cp_kwargs["vmem_limit_bytes"] = int(
            min(cap, max(32 << 20, _round_up(est * 3 // 2, 1 << 20))))
    compiler_params = pltpu.CompilerParams(
        dimension_semantics=("parallel",), **cp_kwargs)

    def const(shape):
        # Full-array block; same block index every step, so it is DMA'd once.
        return pl.BlockSpec(shape, lambda i: (0, 0))

    in_specs = [
        pl.BlockSpec((tn, PACK * D), lambda i: (i, 0)),   # packed x
        const((PACK * D, PACK * H1)),  const((1, PACK * H1)),
        const((PACK * H1, PACK * H2)), const((1, PACK * H2)),
        const((PACK * H2, PACK * C)),  const((1, PACK * C)),
    ]
    out_spec = pl.BlockSpec((tn, PACK * C), lambda i: (i, 0))

    # Advisory cost estimate (actual block-diagonal work / useful HBM bytes).
    flops = 2 * PACK * Bp * (D * H1 + H1 * H2 + H2 * C)
    bytes_accessed = 4 * (Bp * (D + C)
                          + PACK * PACK * (D * H1 + H1 * H2 + H2 * C)
                          + PACK * (H1 + H2 + C))

    out = pl.pallas_call(
        _mlp_kernel,
        out_shape=jax.ShapeDtypeStruct((n, PACK * C), jnp.float32),
        grid_spec=pl.GridSpec(grid=grid, in_specs=in_specs, out_specs=out_spec),
        compiler_params=compiler_params,
        cost_estimate=pl.CostEstimate(flops=flops, transcendentals=0,
                                      bytes_accessed=bytes_accessed),
    )(xp, w1p, b1p, w2p, b2p, w3p, b3p)

    # (n, PACK*C) -> (Bp, C) is again a pure view; slice off the <=7 pad rows.
    return out.reshape(Bp, C)[:B]


def init_params(key, input_size, num_classes):
    """Deterministic synthetic init (shapes match the nn.Linear layers)."""
    k1, k2, k3, k4, k5, k6 = jax.random.split(key, 6)
    # stored as (in, out); equivalent to torch weight.T
    w1 = jax.random.normal(k1, (input_size, H1), jnp.float32) * 0.1
    b1 = jax.random.normal(k2, (1, H1), jnp.float32) * 0.1
    w2 = jax.random.normal(k3, (H1, H2), jnp.float32) * 0.1
    b2 = jax.random.normal(k4, (1, H2), jnp.float32) * 0.1
    w3 = jax.random.normal(k5, (H2, num_classes), jnp.float32) * 0.1
    b3 = jax.random.normal(k6, (1, num_classes), jnp.float32) * 0.1
    return w1, b1, w2, b2, w3, b3


def reference_forward(x, w1, b1, w2, b2, w3, b3):
    hp = jax.lax.Precision.HIGHEST
    h1 = jnp.maximum(jnp.dot(x, w1, precision=hp) + b1, 0.0)
    h2 = jnp.maximum(jnp.dot(h1, w2, precision=hp) + b2, 0.0)
    return jnp.dot(h2, w3, precision=hp) + b3


if __name__ == "__main__":
    input_size = 16
    num_classes = 4

    key = jax.random.PRNGKey(0)
    kx1, kx2, kp = jax.random.split(key, 3)
    params = init_params(kp, input_size, num_classes)

    # Tolerance note: the MXU may evaluate f32 matmuls via bf16 passes
    # depending on generation / default precision, so compare loosely; the
    # weight/bias scales (0.1) make any structural bug show up far above tol.
    TOL = 2e-2

    # Case 1: ragged batch (50 % 8 != 0): tiny tail pad + single-step grid.
    x1 = jax.random.normal(kx1, (50, input_size), jnp.float32)
    out1 = jax.block_until_ready(agent_model_forward(x1, *params))
    ref1 = reference_forward(x1, *params)
    assert out1.shape == (50, num_classes)
    assert jnp.allclose(out1, ref1, atol=TOL, rtol=TOL), "case 1 mismatch"

    # Case 2: multiple-of-8 batch (no pad, x never copied) with a small tile
    # to exercise the multi-step "parallel" grid and a ragged final tile.
    x2 = jax.random.normal(kx2, (200, input_size), jnp.float32)
    out2 = jax.block_until_ready(agent_model_forward(x2, *params, tb=64))
    ref2 = reference_forward(x2, *params)
    assert out2.shape == (200, num_classes)
    assert jnp.allclose(out2, ref2, atol=TOL, rtol=TOL), "case 2 mismatch"

    print("KERNEL_OK")
</pallas_src>

<mosaic_0001>
module attributes {stable_mosaic.version = 11 : i64} {
  func.func @_mlp_kernel(%arg0: i32, %arg1: memref<7x128xf32, #tpu.memory_space<vmem>>, %arg2: memref<128x512xf32, #tpu.memory_space<vmem>>, %arg3: memref<1x512xf32, #tpu.memory_space<vmem>>, %arg4: memref<512x256xf32, #tpu.memory_space<vmem>>, %arg5: memref<1x256xf32, #tpu.memory_space<vmem>>, %arg6: memref<256x32xf32, #tpu.memory_space<vmem>>, %arg7: memref<1x32xf32, #tpu.memory_space<vmem>>, %arg8: memref<7x32xf32, #tpu.memory_space<vmem>>) attributes {dimension_semantics = [#tpu.dimension_semantics<parallel>], iteration_bounds = array<i64: 1>, scalar_prefetch = 0 : i64, scratch_operands = 0 : i64, tpu.core_type = #tpu.core_type<tc>, window_params = [{transform_indices = @transform_0, window_bounds = array<i64: 7, 128>}, {pipeline_mode = #tpu.pipeline_mode<synchronous>, transform_indices = @transform_1, window_bounds = array<i64: 128, 512>}, {pipeline_mode = #tpu.pipeline_mode<synchronous>, transform_indices = @transform_2, window_bounds = array<i64: 1, 512>}, {pipeline_mode = #tpu.pipeline_mode<synchronous>, transform_indices = @transform_3, window_bounds = array<i64: 512, 256>}, {pipeline_mode = #tpu.pipeline_mode<synchronous>, transform_indices = @transform_4, window_bounds = array<i64: 1, 256>}, {pipeline_mode = #tpu.pipeline_mode<synchronous>, transform_indices = @transform_5, window_bounds = array<i64: 256, 32>}, {pipeline_mode = #tpu.pipeline_mode<synchronous>, transform_indices = @transform_6, window_bounds = array<i64: 1, 32>}, {transform_indices = @transform_7, window_bounds = array<i64: 7, 32>}]} {
    %c0 = arith.constant 0 : index
    %c0_0 = arith.constant 0 : index
    %0 = vector.load %arg1[%c0, %c0_0] : memref<7x128xf32, #tpu.memory_space<vmem>>, vector<7x128xf32>
    %c0_1 = arith.constant 0 : index
    %c0_2 = arith.constant 0 : index
    %1 = vector.load %arg2[%c0_1, %c0_2] : memref<128x512xf32, #tpu.memory_space<vmem>>, vector<128x512xf32>
    %cst = arith.constant dense<0.000000e+00> : vector<7x512xf32>
    %2 = tpu.matmul %0, %1, %cst {dimension_numbers = #tpu.dot_dimension_numbers<[1], [0], [0], [1], [0, 0, 1, 1], [], []>} : vector<7x128xf32>, vector<128x512xf32>, vector<7x512xf32> -> vector<7x512xf32>
    %c0_3 = arith.constant 0 : index
    %c0_4 = arith.constant 0 : index
    %3 = vector.load %arg3[%c0_3, %c0_4] : memref<1x512xf32, #tpu.memory_space<vmem>>, vector<1x512xf32>
    %4 = vector.broadcast %3 : vector<1x512xf32> to vector<7x512xf32>
    %5 = arith.addf %2, %4 : vector<7x512xf32>
    %cst_5 = arith.constant 0.000000e+00 : f32
    %6 = vector.broadcast %cst_5 : f32 to vector<7x512xf32>
    %7 = arith.maximumf %5, %6 : vector<7x512xf32>
    %c0_6 = arith.constant 0 : index
    %c0_7 = arith.constant 0 : index
    %8 = vector.load %arg4[%c0_6, %c0_7] : memref<512x256xf32, #tpu.memory_space<vmem>>, vector<512x256xf32>
    %cst_8 = arith.constant dense<0.000000e+00> : vector<7x256xf32>
    %9 = tpu.matmul %7, %8, %cst_8 {dimension_numbers = #tpu.dot_dimension_numbers<[1], [0], [0], [1], [0, 0, 1, 1], [], []>} : vector<7x512xf32>, vector<512x256xf32>, vector<7x256xf32> -> vector<7x256xf32>
    %c0_9 = arith.constant 0 : index
    %c0_10 = arith.constant 0 : index
    %10 = vector.load %arg5[%c0_9, %c0_10] : memref<1x256xf32, #tpu.memory_space<vmem>>, vector<1x256xf32>
    %11 = vector.broadcast %10 : vector<1x256xf32> to vector<7x256xf32>
    %12 = arith.addf %9, %11 : vector<7x256xf32>
    %cst_11 = arith.constant 0.000000e+00 : f32
    %13 = vector.broadcast %cst_11 : f32 to vector<7x256xf32>
    %14 = arith.maximumf %12, %13 : vector<7x256xf32>
    %c0_12 = arith.constant 0 : index
    %c0_13 = arith.constant 0 : index
    %15 = vector.load %arg6[%c0_12, %c0_13] : memref<256x32xf32, #tpu.memory_space<vmem>>, vector<256x32xf32>
    %cst_14 = arith.constant dense<0.000000e+00> : vector<7x32xf32>
    %16 = tpu.matmul %14, %15, %cst_14 {dimension_numbers = #tpu.dot_dimension_numbers<[1], [0], [0], [1], [0, 0, 1, 1], [], []>} : vector<7x256xf32>, vector<256x32xf32>, vector<7x32xf32> -> vector<7x32xf32>
    %c0_15 = arith.constant 0 : index
    %c0_16 = arith.constant 0 : index
    %17 = vector.load %arg7[%c0_15, %c0_16] : memref<1x32xf32, #tpu.memory_space<vmem>>, vector<1x32xf32>
    %18 = vector.broadcast %17 : vector<1x32xf32> to vector<7x32xf32>
    %19 = arith.addf %16, %18 : vector<7x32xf32>
    %c0_17 = arith.constant 0 : index
    %c0_18 = arith.constant 0 : index
    %20 = vector.load %arg8[%c0_17, %c0_18] : memref<7x32xf32, #tpu.memory_space<vmem>>, vector<7x32xf32>
    tpu.vector_store %arg8[%c0_17, %c0_18], %19 {strides = array<i32>} : memref<7x32xf32, #tpu.memory_space<vmem>>, vector<7x32xf32>,
    return
  }
  func.func @transform_0(%arg0: i32) -> (i32, i32) {
    %c0_i32 = arith.constant 0 : i32
    %c0_i32_0 = arith.constant 0 : i32
    return %arg0, %c0_i32 : i32, i32
  }
  func.func @transform_1(%arg0: i32) -> (i32, i32) {
    %c0_i32 = arith.constant 0 : i32
    %c0_i32_0 = arith.constant 0 : i32
    %c0_i32_1 = arith.constant 0 : i32
    return %c0_i32, %c0_i32_0 : i32, i32
  }
  func.func @transform_2(%arg0: i32) -> (i32, i32) {
    %c0_i32 = arith.constant 0 : i32
    %c0_i32_0 = arith.constant 0 : i32
    %c0_i32_1 = arith.constant 0 : i32
    return %c0_i32, %c0_i32_0 : i32, i32
  }
  func.func @transform_3(%arg0: i32) -> (i32, i32) {
    %c0_i32 = arith.constant 0 : i32
    %c0_i32_0 = arith.constant 0 : i32
    %c0_i32_1 = arith.constant 0 : i32
    return %c0_i32, %c0_i32_0 : i32, i32
  }
  func.func @transform_4(%arg0: i32) -> (i32, i32) {
    %c0_i32 = arith.constant 0 : i32
    %c0_i32_0 = arith.constant 0 : i32
    %c0_i32_1 = arith.constant 0 : i32
    return %c0_i32, %c0_i32_0 : i32, i32
  }
  func.func @transform_5(%arg0: i32) -> (i32, i32) {
    %c0_i32 = arith.constant 0 : i32
    %c0_i32_0 = arith.constant 0 : i32
    %c0_i32_1 = arith.constant 0 : i32
    return %c0_i32, %c0_i32_0 : i32, i32
  }
  func.func @transform_6(%arg0: i32) -> (i32, i32) {
    %c0_i32 = arith.constant 0 : i32
    %c0_i32_0 = arith.constant 0 : i32
    %c0_i32_1 = arith.constant 0 : i32
    return %c0_i32, %c0_i32_0 : i32, i32
  }
  func.func @transform_7(%arg0: i32) -> (i32, i32) {
    %c0_i32 = arith.constant 0 : i32
    %c0_i32_0 = arith.constant 0 : i32
    return %arg0, %c0_i32 : i32, i32
  }
}

</mosaic_0001>

<bundles_post_ra>
// kernel: agent_model_forward.1
= control target key start
LH: loop header
LB: loop body
LE: loop exit
PB: predicated region body
PF: predicated region fallthrough
CT: control target
= control target key end

     0   :  { %v695_v3 = vmov 0.0   ;;  %vm652_vm0 = vcmask 260096   ;;  %s1437_s1 = inlined_call_operand.vmem [shape: f32[128,512], index: 1, kind: input, shape index: {}]   ;;  %s1438_s0 = inlined_call_operand.vmem [shape: f32[7,128], index: 0, kind: input, shape index: {}]   ;;  %s1439_s3 = inlined_call_operand.vmem [shape: f32[512,256], index: 3, kind: input, shape index: {}]   ;;  %s1440_s5 = inlined_call_operand.vmem [shape: f32[256,32], index: 5, kind: input, shape index: {}]   ;;  %s1441_s2 = inlined_call_operand.vmem [shape: f32[1,512], index: 2, kind: input, shape index: {}]   ;;  %s1442_s4 = inlined_call_operand.vmem [shape: f32[1,256], index: 4, kind: input, shape index: {}]   ;;  %s1443_s6 = inlined_call_operand.vmem [shape: f32[1,32], index: 6, kind: input, shape index: {}]   ;;  %s1444_s7 = inlined_call_operand.vmem [shape: f32[7,32], index: 7, kind: output, shape index: {}]  }
   0x1   :  { %v88_v0 = vld [vmem:[%s1437_s1 + $0x1e8] sm:$0xff]  ;;  %v90_v1 = vld [vmem:[%s1437_s1 + $0x1f8] sm:$0xff]  ;;  %v87_v2 = vld [vmem:[%s1437_s1 + $0x1e0] sm:$0xff]  ;;  %177 = vmatprep.mubr.f32.mxu0 %v695_v3  ;;  %248 = vmatprep.mubr.f32.mxu1 %v695_v3 }
   0x2   :  { %113 = vmatprep.subr.mxu0 %v88_v0  ;;  %184 = vmatprep.subr.mxu1 %v90_v1  ;;  %v89_v4 = vld [vmem:[%s1437_s1 + $0x1f0] sm:$0xff]  ;;  %v84_v5 = vld [vmem:[%s1437_s1 + $0x1c8] sm:$0xff]  ;;  %v86_v6 = vld [vmem:[%s1437_s1 + $0x1d8] sm:$0xff] }
   0x3   :  { %114 = vmatpush1.msra.mxu0 %v87_v2  ;;  %185 = vmatpush1.msra.mxu1 %v89_v4  ;;  %v83_v7 = vld [vmem:[%s1437_s1 + $0x1c0] sm:$0xff]  ;;  %v85_v8 = vld [vmem:[%s1437_s1 + $0x1d0] sm:$0xff]  ;;  %v80_v9 = vld [vmem:[%s1437_s1 + $0x1a8] sm:$0xff] }
   0x4   :  { %115 = vmatprep.subr.mxu0 %v84_v5  ;;  %186 = vmatprep.subr.mxu1 %v86_v6  ;;  %v82_v10 = vld [vmem:[%s1437_s1 + $0x1b8] sm:$0xff]  ;;  %v79_v11 = vld [vmem:[%s1437_s1 + $0x1a0] sm:$0xff]  ;;  %v81_v12 = vld [vmem:[%s1437_s1 + $0x1b0] sm:$0xff] }
   0x5   :  { %116 = vmatpush1.msra.mxu0 %v83_v7  ;;  %187 = vmatpush1.msra.mxu1 %v85_v8  ;;  %v76_v13 = vld [vmem:[%s1437_s1 + $0x188] sm:$0xff]  ;;  %v78_v14 = vld [vmem:[%s1437_s1 + $0x198] sm:$0xff]  ;;  %v75_v15 = vld [vmem:[%s1437_s1 + $0x180] sm:$0xff] }
   0x6   :  { %117 = vmatprep.subr.mxu0 %v80_v9  ;;  %188 = vmatprep.subr.mxu1 %v82_v10  ;;  %v77_v16 = vld [vmem:[%s1437_s1 + $0x190] sm:$0xff]  ;;  %v72_v17 = vld [vmem:[%s1437_s1 + $0x168] sm:$0xff]  ;;  %v74_v18 = vld [vmem:[%s1437_s1 + $0x178] sm:$0xff] }
   0x7   :  { %118 = vmatpush1.msra.mxu0 %v79_v11  ;;  %189 = vmatpush1.msra.mxu1 %v81_v12  ;;  %v71_v19 = vld [vmem:[%s1437_s1 + $0x160] sm:$0xff]  ;;  %v73_v20 = vld [vmem:[%s1437_s1 + $0x170] sm:$0xff]  ;;  %v68_v21 = vld [vmem:[%s1437_s1 + $0x148] sm:$0xff] }
   0x8   :  { %119 = vmatprep.subr.mxu0 %v76_v13  ;;  %190 = vmatprep.subr.mxu1 %v78_v14  ;;  %v70_v22 = vld [vmem:[%s1437_s1 + $0x158] sm:$0xff]  ;;  %v67_v23 = vld [vmem:[%s1437_s1 + $0x140] sm:$0xff]  ;;  %v69_v24 = vld [vmem:[%s1437_s1 + $0x150] sm:$0xff] }
   0x9   :  { %120 = vmatpush1.msra.mxu0 %v75_v15  ;;  %191 = vmatpush1.msra.mxu1 %v77_v16  ;;  %v64_v25 = vld [vmem:[%s1437_s1 + $0x128] sm:$0xff]  ;;  %v66_v26 = vld [vmem:[%s1437_s1 + $0x138] sm:$0xff]  ;;  %v63_v27 = vld [vmem:[%s1437_s1 + $0x120] sm:$0xff] }
   0xa   :  { %121 = vmatprep.subr.mxu0 %v72_v17  ;;  %192 = vmatprep.subr.mxu1 %v74_v18  ;;  %v65_v28 = vld [vmem:[%s1437_s1 + $0x130] sm:$0xff]  ;;  %v60_v29 = vld [vmem:[%s1437_s1 + $0x108] sm:$0xff]  ;;  %v62_v30 = vld [vmem:[%s1437_s1 + $0x118] sm:$0xff] }
   0xb   :  { %122 = vmatpush1.msra.mxu0 %v71_v19  ;;  %193 = vmatpush1.msra.mxu1 %v73_v20  ;;  %v59_v31 = vld [vmem:[%s1437_s1 + $0x100] sm:$0xff]  ;;  %v61_v32 = vld [vmem:[%s1437_s1 + $0x110] sm:$0xff]  ;;  %v56_v33 = vld [vmem:[%s1437_s1 + $0xe8] sm:$0xff] }
   0xc   :  { %123 = vmatprep.subr.mxu0 %v68_v21  ;;  %194 = vmatprep.subr.mxu1 %v70_v22  ;;  %v58_v34 = vld [vmem:[%s1437_s1 + $0xf8] sm:$0xff]  ;;  %v55_v35 = vld [vmem:[%s1437_s1 + $0xe0] sm:$0xff]  ;;  %v57_v36 = vld [vmem:[%s1437_s1 + $0xf0] sm:$0xff] }
   0xd   :  { %124 = vmatpush1.msra.mxu0 %v67_v23  ;;  %195 = vmatpush1.msra.mxu1 %v69_v24  ;;  %v52_v37 = vld [vmem:[%s1437_s1 + $0xc8] sm:$0xff]  ;;  %v54_v38 = vld [vmem:[%s1437_s1 + $0xd8] sm:$0xff]  ;;  %v51_v39 = vld [vmem:[%s1437_s1 + $0xc0] sm:$0xff] }
   0xe   :  { %125 = vmatprep.subr.mxu0 %v64_v25  ;;  %196 = vmatprep.subr.mxu1 %v66_v26  ;;  %v53_v40 = vld [vmem:[%s1437_s1 + $0xd0] sm:$0xff]  ;;  %v48_v41 = vld [vmem:[%s1437_s1 + $0xa8] sm:$0xff]  ;;  %v50_v42 = vld [vmem:[%s1437_s1 + $0xb8] sm:$0xff] }
   0xf   :  { %126 = vmatpush1.msra.mxu0 %v63_v27  ;;  %197 = vmatpush1.msra.mxu1 %v65_v28  ;;  %v47_v43 = vld [vmem:[%s1437_s1 + $0xa0] sm:$0xff]  ;;  %v49_v44 = vld [vmem:[%s1437_s1 + $0xb0] sm:$0xff]  ;;  %v44_v45 = vld [vmem:[%s1437_s1 + $0x88] sm:$0xff] }
  0x10   :  { %127 = vmatprep.subr.mxu0 %v60_v29  ;;  %198 = vmatprep.subr.mxu1 %v62_v30  ;;  %v46_v46 = vld [vmem:[%s1437_s1 + $0x98] sm:$0xff]  ;;  %v43_v47 = vld [vmem:[%s1437_s1 + $0x80] sm:$0xff]  ;;  %v45_v48 = vld [vmem:[%s1437_s1 + $0x90] sm:$0xff] }
  0x11   :  { %128 = vmatpush1.msra.mxu0 %v59_v31  ;;  %199 = vmatpush1.msra.mxu1 %v61_v32  ;;  %v40_v49 = vld [vmem:[%s1437_s1 + $0x68] sm:$0xff]  ;;  %v42_v50 = vld [vmem:[%s1437_s1 + $0x78] sm:$0xff]  ;;  %v39_v51 = vld [vmem:[%s1437_s1 + $0x60] sm:$0xff] }
  0x12   :  { %129 = vmatprep.subr.mxu0 %v56_v33  ;;  %200 = vmatprep.subr.mxu1 %v58_v34  ;;  %v41_v52 = vld [vmem:[%s1437_s1 + $0x70] sm:$0xff]  ;;  %v36_v53 = vld [vmem:[%s1437_s1 + $0x48] sm:$0xff]  ;;  %v38_v54 = vld [vmem:[%s1437_s1 + $0x58] sm:$0xff] }
  0x13   :  { %130 = vmatpush1.msra.mxu0 %v55_v35  ;;  %201 = vmatpush1.msra.mxu1 %v57_v36  ;;  %v35_v55 = vld [vmem:[%s1437_s1 + $0x40] sm:$0xff]  ;;  %v37_v56 = vld [vmem:[%s1437_s1 + $0x50] sm:$0xff]  ;;  %v32_v57 = vld [vmem:[%s1437_s1 + $0x28] sm:$0xff] }
  0x14   :  { %131 = vmatprep.subr.mxu0 %v52_v37  ;;  %202 = vmatprep.subr.mxu1 %v54_v38  ;;  %v34_v58 = vld [vmem:[%s1437_s1 + $0x38] sm:$0xff]  ;;  %v31_v59 = vld [vmem:[%s1437_s1 + $0x20] sm:$0xff]  ;;  %v33_v60 = vld [vmem:[%s1437_s1 + $0x30] sm:$0xff] }
  0x15   :  { %132 = vmatpush1.msra.mxu0 %v51_v39  ;;  %203 = vmatpush1.msra.mxu1 %v53_v40  ;;  %v28_v61 = vld [vmem:[%s1437_s1 + $0x8] sm:$0xff]  ;;  %v30_v62 = vld [vmem:[%s1437_s1 + $0x18] sm:$0xff]  ;;  %v27_v63 = vld [vmem:[%s1437_s1] sm:$0xff] }
  0x16   :  { %133 = vmatprep.subr.mxu0 %v48_v41  ;;  %204 = vmatprep.subr.mxu1 %v50_v42  ;;  %v29_v0 = vld [vmem:[%s1437_s1 + $0x10] sm:$0xff]  ;;  %v26_v1 = vld [vmem:[%s1438_s0] sm:$0x7f]  ;;  %v290_v2 = vld [vmem:[%s1439_s3 + $0xf8] sm:$0xff] }
  0x17   :  { %134 = vmatpush1.msra.mxu0 %v47_v43  ;;  %205 = vmatpush1.msra.mxu1 %v49_v44  ;;  %v354_v3 = vld [vmem:[%s1439_s3 + $0x2f8] sm:$0xff]  ;;  %v289_v4 = vld [vmem:[%s1439_s3 + $0xf0] sm:$0xff]  ;;  %v288_v6 = vld [vmem:[%s1439_s3 + $0xe8] sm:$0xff] }
  0x18   :  { %135 = vmatprep.subr.mxu0 %v44_v45  ;;  %206 = vmatprep.subr.mxu1 %v46_v46  ;;  %v353_v5 = vld [vmem:[%s1439_s3 + $0x2f0] sm:$0xff]  ;;  %v352_v7 = vld [vmem:[%s1439_s3 + $0x2e8] sm:$0xff]  ;;  %v287_v8 = vld [vmem:[%s1439_s3 + $0xe0] sm:$0xff] }
  0x19   :  { %136 = vmatpush1.msra.mxu0 %v43_v47  ;;  %207 = vmatpush1.msra.mxu1 %v45_v48  ;;  %v351_v9 = vld [vmem:[%s1439_s3 + $0x2e0] sm:$0xff]  ;;  %v286_v10 = vld [vmem:[%s1439_s3 + $0xd8] sm:$0xff]  ;;  %v285_v12 = vld [vmem:[%s1439_s3 + $0xd0] sm:$0xff] }
  0x1a   :  { %137 = vmatprep.subr.mxu0 %v40_v49  ;;  %208 = vmatprep.subr.mxu1 %v42_v50  ;;  %v350_v11 = vld [vmem:[%s1439_s3 + $0x2d8] sm:$0xff]  ;;  %v349_v13 = vld [vmem:[%s1439_s3 + $0x2d0] sm:$0xff]  ;;  %v284_v14 = vld [vmem:[%s1439_s3 + $0xc8] sm:$0xff] }
  0x1b   :  { %138 = vmatpush1.msra.mxu0 %v39_v51  ;;  %209 = vmatpush1.msra.mxu1 %v41_v52  ;;  %v348_v15 = vld [vmem:[%s1439_s3 + $0x2c8] sm:$0xff]  ;;  %v283_v16 = vld [vmem:[%s1439_s3 + $0xc0] sm:$0xff]  ;;  %v282_v18 = vld [vmem:[%s1439_s3 + $0xb8] sm:$0xff] }
  0x1c   :  { %139 = vmatprep.subr.mxu0 %v36_v53  ;;  %210 = vmatprep.subr.mxu1 %v38_v54  ;;  %v347_v17 = vld [vmem:[%s1439_s3 + $0x2c0] sm:$0xff]  ;;  %v346_v19 = vld [vmem:[%s1439_s3 + $0x2b8] sm:$0xff]  ;;  %v281_v20 = vld [vmem:[%s1439_s3 + $0xb0] sm:$0xff] }
  0x1d   :  { %140 = vmatpush1.msra.mxu0 %v35_v55  ;;  %211 = vmatpush1.msra.mxu1 %v37_v56  ;;  %v345_v21 = vld [vmem:[%s1439_s3 + $0x2b0] sm:$0xff]  ;;  %v280_v22 = vld [vmem:[%s1439_s3 + $0xa8] sm:$0xff]  ;;  %v279_v24 = vld [vmem:[%s1439_s3 + $0xa0] sm:$0xff] }
  0x1e   :  { %141 = vmatprep.subr.mxu0 %v32_v57  ;;  %212 = vmatprep.subr.mxu1 %v34_v58  ;;  %v344_v23 = vld [vmem:[%s1439_s3 + $0x2a8] sm:$0xff]  ;;  %v343_v25 = vld [vmem:[%s1439_s3 + $0x2a0] sm:$0xff]  ;;  %v278_v26 = vld [vmem:[%s1439_s3 + $0x98] sm:$0xff] }
  0x1f   :  { %142 = vmatpush1.msra.mxu0 %v31_v59  ;;  %213 = vmatpush1.msra.mxu1 %v33_v60  ;;  %v342_v27 = vld [vmem:[%s1439_s3 + $0x298] sm:$0xff]  ;;  %v277_v28 = vld [vmem:[%s1439_s3 + $0x90] sm:$0xff]  ;;  %v276_v30 = vld [vmem:[%s1439_s3 + $0x88] sm:$0xff] }
  0x20   :  { %143 = vmatprep.subr.mxu0 %v28_v61  ;;  %214 = vmatprep.subr.mxu1 %v30_v62  ;;  %v341_v29 = vld [vmem:[%s1439_s3 + $0x290] sm:$0xff]  ;;  %v340_v31 = vld [vmem:[%s1439_s3 + $0x288] sm:$0xff]  ;;  %v275_v32 = vld [vmem:[%s1439_s3 + $0x80] sm:$0xff] }
  0x21   :  { %144 = vmatpush1.msra.mxu0 %v27_v63  ;;  %215 = vmatpush1.msra.mxu1 %v29_v0  ;;  %v339_v33 = vld [vmem:[%s1439_s3 + $0x280] sm:$0xff]  ;;  %v274_v34 = vld [vmem:[%s1439_s3 + $0x78] sm:$0xff]  ;;  %v273_v36 = vld [vmem:[%s1439_s3 + $0x70] sm:$0xff] }
  0x22   :  { %178 = vmatmul.mubr.f32.vlgmr.msra.gmra.mxu0 %v26_v1  ;;  %249 = vmatmul.mubr.f32.vlgmr.msra.gmra.mxu1 %v26_v1  ;;  %v338_v35 = vld [vmem:[%s1439_s3 + $0x278] sm:$0xff]  ;;  %v337_v37 = vld [vmem:[%s1439_s3 + $0x270] sm:$0xff]  ;;  %v272_v38 = vld [vmem:[%s1439_s3 + $0x68] sm:$0xff] }
  0x23   :  { %399 = vmatprep.subr.mxu0 %v290_v2  ;;  %470 = vmatprep.subr.mxu1 %v354_v3  ;;  %v336_v39 = vld [vmem:[%s1439_s3 + $0x268] sm:$0xff]  ;;  %v271_v40 = vld [vmem:[%s1439_s3 + $0x60] sm:$0xff]  ;;  %v270_v42 = vld [vmem:[%s1439_s3 + $0x58] sm:$0xff] }
  0x24   :  { %400 = vmatpush1.msra.mxu0 %v289_v4  ;;  %471 = vmatpush1.msra.mxu1 %v353_v5  ;;  %v335_v41 = vld [vmem:[%s1439_s3 + $0x260] sm:$0xff]  ;;  %v334_v43 = vld [vmem:[%s1439_s3 + $0x258] sm:$0xff]  ;;  %v269_v44 = vld [vmem:[%s1439_s3 + $0x50] sm:$0xff] }
  0x25   :  { %401 = vmatprep.subr.mxu0 %v288_v6  ;;  %472 = vmatprep.subr.mxu1 %v352_v7  ;;  %v333_v45 = vld [vmem:[%s1439_s3 + $0x250] sm:$0xff]  ;;  %v268_v46 = vld [vmem:[%s1439_s3 + $0x48] sm:$0xff]  ;;  %v267_v48 = vld [vmem:[%s1439_s3 + $0x40] sm:$0xff] }
  0x26   :  { %402 = vmatpush1.msra.mxu0 %v287_v8  ;;  %473 = vmatpush1.msra.mxu1 %v351_v9  ;;  %v332_v47 = vld [vmem:[%s1439_s3 + $0x248] sm:$0xff]  ;;  %v331_v49 = vld [vmem:[%s1439_s3 + $0x240] sm:$0xff]  ;;  %v266_v50 = vld [vmem:[%s1439_s3 + $0x38] sm:$0xff] }
  0x27   :  { %403 = vmatprep.subr.mxu0 %v286_v10  ;;  %474 = vmatprep.subr.mxu1 %v350_v11  ;;  %v330_v51 = vld [vmem:[%s1439_s3 + $0x238] sm:$0xff]  ;;  %v265_v52 = vld [vmem:[%s1439_s3 + $0x30] sm:$0xff]  ;;  %v264_v54 = vld [vmem:[%s1439_s3 + $0x28] sm:$0xff] }
  0x28   :  { %404 = vmatpush1.msra.mxu0 %v285_v12  ;;  %475 = vmatpush1.msra.mxu1 %v349_v13  ;;  %v329_v53 = vld [vmem:[%s1439_s3 + $0x230] sm:$0xff]  ;;  %v328_v55 = vld [vmem:[%s1439_s3 + $0x228] sm:$0xff]  ;;  %v263_v56 = vld [vmem:[%s1439_s3 + $0x20] sm:$0xff] }
  0x29   :  { %405 = vmatprep.subr.mxu0 %v284_v14  ;;  %476 = vmatprep.subr.mxu1 %v348_v15  ;;  %v327_v57 = vld [vmem:[%s1439_s3 + $0x220] sm:$0xff]  ;;  %v262_v58 = vld [vmem:[%s1439_s3 + $0x18] sm:$0xff]  ;;  %v261_v60 = vld [vmem:[%s1439_s3 + $0x10] sm:$0xff] }
  0x2a   :  { %406 = vmatpush1.msra.mxu0 %v283_v16  ;;  %477 = vmatpush1.msra.mxu1 %v347_v17  ;;  %v326_v59 = vld [vmem:[%s1439_s3 + $0x218] sm:$0xff]  ;;  %v325_v61 = vld [vmem:[%s1439_s3 + $0x210] sm:$0xff]  ;;  %v260_v62 = vld [vmem:[%s1439_s3 + $0x8] sm:$0xff] }
  0x2b   :  { %407 = vmatprep.subr.mxu0 %v282_v18  ;;  %478 = vmatprep.subr.mxu1 %v346_v19  ;;  %v324_v63 = vld [vmem:[%s1439_s3 + $0x208] sm:$0xff]  ;;  %v259_v0 = vld [vmem:[%s1439_s3] sm:$0xff]  ;;  %v322_v2 = vld [vmem:[%s1439_s3 + $0x1f8] sm:$0xff] }
  0x2c   :  { %408 = vmatpush1.msra.mxu0 %v281_v20  ;;  %479 = vmatpush1.msra.mxu1 %v345_v21  ;;  %v323_v1 = vld [vmem:[%s1439_s3 + $0x200] sm:$0xff]  ;;  %v386_v3 = vld [vmem:[%s1439_s3 + $0x3f8] sm:$0xff]  ;;  %v321_v4 = vld [vmem:[%s1439_s3 + $0x1f0] sm:$0xff] }
  0x2d   :  { %409 = vmatprep.subr.mxu0 %v280_v22  ;;  %480 = vmatprep.subr.mxu1 %v344_v23  ;;  %v385_v5 = vld [vmem:[%s1439_s3 + $0x3f0] sm:$0xff]  ;;  %v320_v6 = vld [vmem:[%s1439_s3 + $0x1e8] sm:$0xff]  ;;  %v319_v8 = vld [vmem:[%s1439_s3 + $0x1e0] sm:$0xff] }
  0x2e   :  { %410 = vmatpush1.msra.mxu0 %v279_v24  ;;  %481 = vmatpush1.msra.mxu1 %v343_v25  ;;  %v384_v7 = vld [vmem:[%s1439_s3 + $0x3e8] sm:$0xff]  ;;  %v383_v9 = vld [vmem:[%s1439_s3 + $0x3e0] sm:$0xff]  ;;  %v318_v10 = vld [vmem:[%s1439_s3 + $0x1d8] sm:$0xff] }
  0x2f   :  { %411 = vmatprep.subr.mxu0 %v278_v26  ;;  %482 = vmatprep.subr.mxu1 %v342_v27  ;;  %v382_v11 = vld [vmem:[%s1439_s3 + $0x3d8] sm:$0xff]  ;;  %v317_v12 = vld [vmem:[%s1439_s3 + $0x1d0] sm:$0xff]  ;;  %v316_v14 = vld [vmem:[%s1439_s3 + $0x1c8] sm:$0xff] }
  0x30   :  { %412 = vmatpush1.msra.mxu0 %v277_v28  ;;  %483 = vmatpush1.msra.mxu1 %v341_v29  ;;  %v381_v13 = vld [vmem:[%s1439_s3 + $0x3d0] sm:$0xff]  ;;  %v380_v15 = vld [vmem:[%s1439_s3 + $0x3c8] sm:$0xff]  ;;  %v315_v16 = vld [vmem:[%s1439_s3 + $0x1c0] sm:$0xff] }
  0x31   :  { %413 = vmatprep.subr.mxu0 %v276_v30  ;;  %484 = vmatprep.subr.mxu1 %v340_v31  ;;  %v379_v17 = vld [vmem:[%s1439_s3 + $0x3c0] sm:$0xff]  ;;  %v314_v18 = vld [vmem:[%s1439_s3 + $0x1b8] sm:$0xff]  ;;  %v313_v20 = vld [vmem:[%s1439_s3 + $0x1b0] sm:$0xff] }
  0x32   :  { %414 = vmatpush1.msra.mxu0 %v275_v32  ;;  %485 = vmatpush1.msra.mxu1 %v339_v33  ;;  %v378_v19 = vld [vmem:[%s1439_s3 + $0x3b8] sm:$0xff]  ;;  %v377_v21 = vld [vmem:[%s1439_s3 + $0x3b0] sm:$0xff]  ;;  %v312_v22 = vld [vmem:[%s1439_s3 + $0x1a8] sm:$0xff] }
  0x33   :  { %415 = vmatprep.subr.mxu0 %v274_v34  ;;  %486 = vmatprep.subr.mxu1 %v338_v35  ;;  %v376_v23 = vld [vmem:[%s1439_s3 + $0x3a8] sm:$0xff]  ;;  %v311_v24 = vld [vmem:[%s1439_s3 + $0x1a0] sm:$0xff]  ;;  %v310_v26 = vld [vmem:[%s1439_s3 + $0x198] sm:$0xff] }
  0x34   :  { %416 = vmatpush1.msra.mxu0 %v273_v36  ;;  %487 = vmatpush1.msra.mxu1 %v337_v37  ;;  %v375_v25 = vld [vmem:[%s1439_s3 + $0x3a0] sm:$0xff]  ;;  %v374_v27 = vld [vmem:[%s1439_s3 + $0x398] sm:$0xff]  ;;  %v309_v28 = vld [vmem:[%s1439_s3 + $0x190] sm:$0xff] }
  0x35   :  { %417 = vmatprep.subr.mxu0 %v272_v38  ;;  %488 = vmatprep.subr.mxu1 %v336_v39  ;;  %v373_v29 = vld [vmem:[%s1439_s3 + $0x390] sm:$0xff]  ;;  %v308_v30 = vld [vmem:[%s1439_s3 + $0x188] sm:$0xff]  ;;  %v307_v32 = vld [vmem:[%s1439_s3 + $0x180] sm:$0xff] }
  0x36   :  { %418 = vmatpush1.msra.mxu0 %v271_v40  ;;  %489 = vmatpush1.msra.mxu1 %v335_v41  ;;  %v372_v31 = vld [vmem:[%s1439_s3 + $0x388] sm:$0xff]  ;;  %v371_v33 = vld [vmem:[%s1439_s3 + $0x380] sm:$0xff]  ;;  %v306_v34 = vld [vmem:[%s1439_s3 + $0x178] sm:$0xff] }
  0x37   :  { %419 = vmatprep.subr.mxu0 %v270_v42  ;;  %490 = vmatprep.subr.mxu1 %v334_v43  ;;  %v370_v35 = vld [vmem:[%s1439_s3 + $0x378] sm:$0xff]  ;;  %v305_v36 = vld [vmem:[%s1439_s3 + $0x170] sm:$0xff]  ;;  %v304_v38 = vld [vmem:[%s1439_s3 + $0x168] sm:$0xff] }
  0x38   :  { %420 = vmatpush1.msra.mxu0 %v269_v44  ;;  %491 = vmatpush1.msra.mxu1 %v333_v45  ;;  %v369_v37 = vld [vmem:[%s1439_s3 + $0x370] sm:$0xff]  ;;  %v368_v39 = vld [vmem:[%s1439_s3 + $0x368] sm:$0xff]  ;;  %v303_v40 = vld [vmem:[%s1439_s3 + $0x160] sm:$0xff] }
  0x39   :  { %421 = vmatprep.subr.mxu0 %v268_v46  ;;  %492 = vmatprep.subr.mxu1 %v332_v47  ;;  %v367_v41 = vld [vmem:[%s1439_s3 + $0x360] sm:$0xff]  ;;  %v302_v42 = vld [vmem:[%s1439_s3 + $0x158] sm:$0xff]  ;;  %v301_v44 = vld [vmem:[%s1439_s3 + $0x150] sm:$0xff] }
  0x3a   :  { %422 = vmatpush1.msra.mxu0 %v267_v48  ;;  %493 = vmatpush1.msra.mxu1 %v331_v49  ;;  %v366_v43 = vld [vmem:[%s1439_s3 + $0x358] sm:$0xff]  ;;  %v365_v45 = vld [vmem:[%s1439_s3 + $0x350] sm:$0xff]  ;;  %v300_v46 = vld [vmem:[%s1439_s3 + $0x148] sm:$0xff] }
  0x3b   :  { %423 = vmatprep.subr.mxu0 %v266_v50  ;;  %494 = vmatprep.subr.mxu1 %v330_v51  ;;  %v364_v47 = vld [vmem:[%s1439_s3 + $0x348] sm:$0xff]  ;;  %v299_v48 = vld [vmem:[%s1439_s3 + $0x140] sm:$0xff]  ;;  %v298_v50 = vld [vmem:[%s1439_s3 + $0x138] sm:$0xff] }
  0x3c   :  { %424 = vmatpush1.msra.mxu0 %v265_v52  ;;  %495 = vmatpush1.msra.mxu1 %v329_v53  ;;  %v363_v49 = vld [vmem:[%s1439_s3 + $0x340] sm:$0xff]  ;;  %v362_v51 = vld [vmem:[%s1439_s3 + $0x338] sm:$0xff]  ;;  %v297_v52 = vld [vmem:[%s1439_s3 + $0x130] sm:$0xff] }
  0x3d   :  { %425 = vmatprep.subr.mxu0 %v264_v54  ;;  %496 = vmatprep.subr.mxu1 %v328_v55  ;;  %v361_v53 = vld [vmem:[%s1439_s3 + $0x330] sm:$0xff]  ;;  %v296_v54 = vld [vmem:[%s1439_s3 + $0x128] sm:$0xff] }
  0x3e   :  { %426 = vmatpush1.msra.mxu0 %v263_v56  ;;  %497 = vmatpush1.msra.mxu1 %v327_v57  ;;  %v360_v55 = vld [vmem:[%s1439_s3 + $0x328] sm:$0xff]  ;;  %v295_v56 = vld [vmem:[%s1439_s3 + $0x120] sm:$0xff] }
  0x3f   :  { %427 = vmatprep.subr.mxu0 %v262_v58  ;;  %498 = vmatprep.subr.mxu1 %v326_v59  ;;  %v359_v57 = vld [vmem:[%s1439_s3 + $0x320] sm:$0xff]  ;;  %v294_v58 = vld [vmem:[%s1439_s3 + $0x118] sm:$0xff] }
  0x40   :  { %428 = vmatpush1.msra.mxu0 %v261_v60  ;;  %499 = vmatpush1.msra.mxu1 %v325_v61  ;;  %v358_v59 = vld [vmem:[%s1439_s3 + $0x318] sm:$0xff]  ;;  %v293_v60 = vld [vmem:[%s1439_s3 + $0x110] sm:$0xff] }
  0x41   :  { %429 = vmatprep.subr.mxu0 %v260_v62  ;;  %500 = vmatprep.subr.mxu1 %v324_v63  ;;  %v357_v61 = vld [vmem:[%s1439_s3 + $0x310] sm:$0xff]  ;;  %v292_v62 = vld [vmem:[%s1439_s3 + $0x108] sm:$0xff] }
  0x42   :  { %430 = vmatpush1.msra.mxu0 %v259_v0  ;;  %501 = vmatpush1.msra.mxu1 %v323_v1  ;;  %v356_v63 = vld [vmem:[%s1439_s3 + $0x308] sm:$0xff]  ;;  %v291_v0 = vld [vmem:[%s1439_s3 + $0x100] sm:$0xff] }
  0x43   :  { %431 = vmatprep.subr.mxu0 %v322_v2  ;;  %502 = vmatprep.subr.mxu1 %v386_v3  ;;  %v355_v1 = vld [vmem:[%s1439_s3 + $0x300] sm:$0xff]  ;;  %v574_v2 = vld [vmem:[%s1440_s5 + $0xf8] sm:$0xff]  ;;  %v93_v3 = vlaneseq }
  0x44   :  { %432 = vmatpush2.msra.mxu0 %v321_v4  ;;  %503 = vmatpush2.msra.mxu1 %v385_v5 }
  0x45   :  { %433 = vmatprep.subr.mxu0 %v320_v6  ;;  %504 = vmatprep.subr.mxu1 %v384_v7  ;;  %v1318_v4 = vshrl.u32 %v93_v3, 7  ;;  %v91_v7 = vld [vmem:[%s1441_s2] sm:$0xf] }
  0x46   :  { %434 = vmatpush2.msra.mxu0 %v319_v8  ;;  %505 = vmatpush2.msra.mxu1 %v383_v9 }
  0x47   :  { %435 = vmatprep.subr.mxu0 %v318_v10  ;;  %506 = vmatprep.subr.mxu1 %v382_v11  ;;  %v103_v5 = vsub.s32 2, %v1318_v4  ;;  %v95_v6 = vsub.s32 0, %v1318_v4  ;;  %v99_v8 = vsub.s32 1, %v1318_v4  ;;  %v107_v9 = vsub.s32 3, %v1318_v4 }
  0x48   :  { %436 = vmatpush2.msra.mxu0 %v317_v12  ;;  %507 = vmatpush2.msra.mxu1 %v381_v13 }
  0x49   :  { %437 = vmatprep.subr.mxu0 %v316_v14  ;;  %508 = vmatprep.subr.mxu1 %v380_v15  ;;  %v104_v10 = vrot.slane %v91_v7, %v103_v5  ;;  %v96_v11 = vrot.slane %v91_v7, %v95_v6  ;;  %v100_v12 = vrot.slane %v91_v7, %v99_v8 }
  0x4a   :  { %438 = vmatpush2.msra.mxu0 %v315_v16  ;;  %509 = vmatpush2.msra.mxu1 %v379_v17  ;;  %v108_v13 = vrot.slane %v91_v7, %v107_v9 }
  0x4b   :  { %439 = vmatprep.subr.mxu0 %v314_v18  ;;  %510 = vmatprep.subr.mxu1 %v378_v19 }
  0x4c   :  { %440 = vmatpush2.msra.mxu0 %v313_v20  ;;  %511 = vmatpush2.msra.mxu1 %v377_v21 }
  0x4d   :  { %441 = vmatprep.subr.mxu0 %v312_v22  ;;  %512 = vmatprep.subr.mxu1 %v376_v23 }
  0x4e   :  { %442 = vmatpush2.msra.mxu0 %v311_v24  ;;  %513 = vmatpush2.msra.mxu1 %v375_v25 }
  0x4f   :  { %443 = vmatprep.subr.mxu0 %v310_v26  ;;  %514 = vmatprep.subr.mxu1 %v374_v27  ;;  %v558_v26 = vld [vmem:[%s1440_s5 + $0x78] sm:$0xff]  ;;  %v573_v27 = vld [vmem:[%s1440_s5 + $0xf0] sm:$0xff] }
  0x50   :  { %444 = vmatpush2.msra.mxu0 %v309_v28  ;;  %515 = vmatpush2.msra.mxu1 %v373_v29  ;;  %v557_v28 = vld [vmem:[%s1440_s5 + $0x70] sm:$0xff]  ;;  %v572_v29 = vld [vmem:[%s1440_s5 + $0xe8] sm:$0xff] }
  0x51   :  { %445 = vmatprep.subr.mxu0 %v308_v30  ;;  %516 = vmatprep.subr.mxu1 %v372_v31  ;;  %v556_v30 = vld [vmem:[%s1440_s5 + $0x68] sm:$0xff]  ;;  %v571_v31 = vld [vmem:[%s1440_s5 + $0xe0] sm:$0xff] }
  0x52   :  { %446 = vmatpush2.msra.mxu0 %v307_v32  ;;  %517 = vmatpush2.msra.mxu1 %v371_v33  ;;  %v555_v32 = vld [vmem:[%s1440_s5 + $0x60] sm:$0xff]  ;;  %v570_v33 = vld [vmem:[%s1440_s5 + $0xd8] sm:$0xff] }
  0x53   :  { %447 = vmatprep.subr.mxu0 %v306_v34  ;;  %518 = vmatprep.subr.mxu1 %v370_v35  ;;  %v554_v34 = vld [vmem:[%s1440_s5 + $0x58] sm:$0xff]  ;;  %v569_v35 = vld [vmem:[%s1440_s5 + $0xd0] sm:$0xff] }
  0x54   :  { %448 = vmatpush2.msra.mxu0 %v305_v36  ;;  %519 = vmatpush2.msra.mxu1 %v369_v37  ;;  %v553_v36 = vld [vmem:[%s1440_s5 + $0x50] sm:$0xff]  ;;  %v568_v37 = vld [vmem:[%s1440_s5 + $0xc8] sm:$0xff] }
  0x55   :  { %449 = vmatprep.subr.mxu0 %v304_v38  ;;  %520 = vmatprep.subr.mxu1 %v368_v39  ;;  %v552_v38 = vld [vmem:[%s1440_s5 + $0x48] sm:$0xff]  ;;  %v567_v39 = vld [vmem:[%s1440_s5 + $0xc0] sm:$0xff] }
  0x56   :  { %450 = vmatpush2.msra.mxu0 %v303_v40  ;;  %521 = vmatpush2.msra.mxu1 %v367_v41  ;;  %v551_v40 = vld [vmem:[%s1440_s5 + $0x40] sm:$0xff]  ;;  %v566_v41 = vld [vmem:[%s1440_s5 + $0xb8] sm:$0xff] }
  0x57   :  { %451 = vmatprep.subr.mxu0 %v302_v42  ;;  %522 = vmatprep.subr.mxu1 %v366_v43  ;;  %v550_v42 = vld [vmem:[%s1440_s5 + $0x38] sm:$0xff]  ;;  %v565_v43 = vld [vmem:[%s1440_s5 + $0xb0] sm:$0xff] }
  0x58   :  { %452 = vmatpush2.msra.mxu0 %v301_v44  ;;  %523 = vmatpush2.msra.mxu1 %v365_v45  ;;  %v549_v44 = vld [vmem:[%s1440_s5 + $0x30] sm:$0xff]  ;;  %v564_v45 = vld [vmem:[%s1440_s5 + $0xa8] sm:$0xff] }
  0x59   :  { %453 = vmatprep.subr.mxu0 %v300_v46  ;;  %524 = vmatprep.subr.mxu1 %v364_v47  ;;  %v548_v46 = vld [vmem:[%s1440_s5 + $0x28] sm:$0xff]  ;;  %v563_v47 = vld [vmem:[%s1440_s5 + $0xa0] sm:$0xff] }
  0x5a   :  { %454 = vmatpush2.msra.mxu0 %v299_v48  ;;  %525 = vmatpush2.msra.mxu1 %v363_v49  ;;  %v547_v48 = vld [vmem:[%s1440_s5 + $0x20] sm:$0xff]  ;;  %v562_v49 = vld [vmem:[%s1440_s5 + $0x98] sm:$0xff] }
  0x5b   :  { %455 = vmatprep.subr.mxu0 %v298_v50  ;;  %526 = vmatprep.subr.mxu1 %v362_v51  ;;  %v546_v50 = vld [vmem:[%s1440_s5 + $0x18] sm:$0xff]  ;;  %v561_v51 = vld [vmem:[%s1440_s5 + $0x90] sm:$0xff] }
  0x5c   :  { %456 = vmatpush2.msra.mxu0 %v297_v52  ;;  %527 = vmatpush2.msra.mxu1 %v361_v53  ;;  %v545_v52 = vld [vmem:[%s1440_s5 + $0x10] sm:$0xff]  ;;  %v560_v53 = vld [vmem:[%s1440_s5 + $0x88] sm:$0xff] }
  0x5d   :  { %457 = vmatprep.subr.mxu0 %v296_v54  ;;  %528 = vmatprep.subr.mxu1 %v360_v55  ;;  %v544_v54 = vld [vmem:[%s1440_s5 + $0x8] sm:$0xff]  ;;  %v559_v55 = vld [vmem:[%s1440_s5 + $0x80] sm:$0xff] }
  0x5e   :  { %458 = vmatpush2.msra.mxu0 %v295_v56  ;;  %529 = vmatpush2.msra.mxu1 %v359_v57  ;;  %v543_v56 = vld [vmem:[%s1440_s5] sm:$0xff] }
  0x5f   :  { %459 = vmatprep.subr.mxu0 %v294_v58  ;;  %530 = vmatprep.subr.mxu1 %v358_v59  ;;  %v387_v57 = vld [vmem:[%s1442_s4] sm:$0x3] }
  0x60   :  { %460 = vmatpush2.msra.mxu0 %v293_v60  ;;  %531 = vmatpush2.msra.mxu1 %v357_v61  ;;  %v392_v58 = vrot.slane %v387_v57, %v95_v6  ;;  %v396_v59 = vrot.slane %v387_v57, %v99_v8  ;;  %v658_v6 = vld [vmem:[%s1443_s6] ss:$0 sm:$0xff] }
  0x61   :  { %461 = vmatprep.subr.mxu0 %v292_v62  ;;  %532 = vmatprep.subr.mxu1 %v356_v63 }
  0x62   :  { %462 = vmatpush2.msra.mxu0 %v291_v0  ;;  %533 = vmatpush2.msra.mxu1 %v355_v1 }
  0x63   :  { %659 = vmatprep.subr.mxu0 %v574_v2 }
  0xe2   :  { %v179_v14 = vpop.f32.mrf.mxu0  ;;  %v250_v15 = vpop.f32.mrf.mxu1 }
  0xe3   :  { %v251_v16 = vadd.f32 %v250_v15, %v104_v10  ;;  %v180_v17 = vadd.f32 %v179_v14, %v96_v11 }
  0xe4   :  { %v181_v18 = vpop.f32.mrf.mxu0  ;;  %v252_v19 = vpop.f32.mrf.mxu1 }
  0xe5   :  { %v182_v20 = vadd.f32 %v181_v18, %v100_v12  ;;  %v253_v21 = vadd.f32 %v252_v19, %v108_v13  ;;  %v257_v22 = vmax.f32 %v251_v16, 0.0  ;;  %v255_v25 = vmax.f32 %v180_v17, 0.0 }
  0xe7   :  { %v256_v23 = vmax.f32 %v182_v20, 0.0  ;;  %v258_v24 = vmax.f32 %v253_v21, 0.0 }
  0xe9   :  { %463 = vmatprep.mubr.f32.mxu0 %v256_v23  ;;  %534 = vmatprep.mubr.f32.mxu1 %v258_v24 }
  0xea   :  { %464 = vmatmul.mubr.f32.vlgmr.msra.gmra.mxu0 %v255_v25  ;;  %535 = vmatmul.mubr.f32.vlgmr.msra.gmra.mxu1 %v257_v22 }
  0xeb   :  { %660 = vmatpush3.msra.mxu0 %v558_v26 }
  0xec   :  { %661 = vmatprep.subr.mxu0 %v573_v27 }
  0xed   :  { %662 = vmatpush3.msra.mxu0 %v557_v28 }
  0xee   :  { %663 = vmatprep.subr.mxu0 %v572_v29 }
  0xef   :  { %664 = vmatpush3.msra.mxu0 %v556_v30 }
  0xf0   :  { %665 = vmatprep.subr.mxu0 %v571_v31 }
  0xf1   :  { %666 = vmatpush3.msra.mxu0 %v555_v32 }
  0xf2   :  { %667 = vmatprep.subr.mxu0 %v570_v33 }
  0xf3   :  { %668 = vmatpush3.msra.mxu0 %v554_v34 }
  0xf4   :  { %669 = vmatprep.subr.mxu0 %v569_v35 }
  0xf5   :  { %670 = vmatpush3.msra.mxu0 %v553_v36 }
  0xf6   :  { %671 = vmatprep.subr.mxu0 %v568_v37 }
  0xf7   :  { %672 = vmatpush3.msra.mxu0 %v552_v38 }
  0xf8   :  { %673 = vmatprep.subr.mxu0 %v567_v39 }
  0xf9   :  { %674 = vmatpush3.msra.mxu0 %v551_v40 }
  0xfa   :  { %675 = vmatprep.subr.mxu0 %v566_v41 }
  0xfb   :  { %676 = vmatpush3.msra.mxu0 %v550_v42 }
  0xfc   :  { %677 = vmatprep.subr.mxu0 %v565_v43 }
  0xfd   :  { %678 = vmatpush3.msra.mxu0 %v549_v44 }
  0xfe   :  { %679 = vmatprep.subr.mxu0 %v564_v45 }
  0xff   :  { %680 = vmatpush3.msra.mxu0 %v548_v46 }
 0x100   :  { %681 = vmatprep.subr.mxu0 %v563_v47 }
 0x101   :  { %682 = vmatpush3.msra.mxu0 %v547_v48 }
 0x102   :  { %683 = vmatprep.subr.mxu0 %v562_v49 }
 0x103   :  { %684 = vmatpush3.msra.mxu0 %v546_v50 }
 0x104   :  { %685 = vmatprep.subr.mxu0 %v561_v51 }
 0x105   :  { %686 = vmatpush3.msra.mxu0 %v545_v52 }
 0x106   :  { %687 = vmatprep.subr.mxu0 %v560_v53 }
 0x107   :  { %688 = vmatpush3.msra.mxu0 %v544_v54 }
 0x108   :  { %689 = vmatprep.subr.mxu0 %v559_v55 }
 0x109   :  { %690 = vmatpush3.msra.mxu0 %v543_v56 }
 0x1aa   :  { %v465_v60 = vpop.f32.mrf.mxu0  ;;  %v536_v61 = vpop.f32.mrf.mxu1 }
 0x1ab   :  { %v466_v62 = vadd.f32 %v465_v60, %v392_v58 }
 0x1ac   :  { %v467_v63 = vpop.f32.mrf.mxu0  ;;  %v538_v2 = vpop.f32.mrf.mxu1 }
 0x1ad   :  { %v468_v0 = vadd.f32 %v467_v63, %v396_v59  ;;  %v537_v1 = vadd.f32 %v536_v61, %v466_v62 }
 0x1af   :  { %v539_v3 = vadd.f32 %v538_v2, %v468_v0  ;;  %v541_v7 = vmax.f32 %v537_v1, 0.0 }
 0x1b1   :  { %v542_v5 = vmax.f32 %v539_v3, 0.0 }
 0x1b3   :  { %646 = vmatprep.mubr.f32.mxu0 %v542_v5 }
 0x1b4   :  { %647 = vmatmul.mubr.f32.vlgmr.msra.gmra.mxu0 %v541_v7 }
 0x274   :  { %v691_v9 = vpop.f32.mrf.mxu0 }
 0x276   :  { %v692_v10 = vpop.f32.mrf.mxu0 }
 0x277   :  { %v693_v4 = vadd.f32 %v692_v10, %v691_v9 }
 0x279   :  { %v649_v8 = vadd.f32 %v693_v4, %v658_v6 }
 0x27b   :  { %653 = vst.msk [vmem:[%s1444_s7] sm:$0x7f] %vm652_vm0, %v649_v8 }

</bundles_post_ra>
